<compile_context>
chip_gen: v5e
topology: v5e:2x2
jax: 0.10.0
libtpu: 0.0.40
codegen_flags: <defaults>
</compile_context>

<pallas_src>
import jax
import jax.numpy as jnp
from jax.experimental import pallas as pl
from jax.experimental.pallas import tpu as pltpu

IN_FEATURES = 100
OUT_FEATURES = 50
# Batch rows per grid step.  Sweepable: v7x 4096-8192, v6e 2048-4096, v5e <= 2048-4096
# (raise vmem_limit_bytes before going past ~4096 on v5e's 16 MiB scoped default).
TB_MAX = 2048


def _round_up(n, m):
    return ((n + m - 1) // m) * m


def simplenet_kernel(x_ref, wt_ref, b_ref, o_ref):
    # x_ref:  [TB, 100] f32   (cast to bf16 here, not in the wrapper)
    # wt_ref: [100, 50] bf16  (pre-transposed weight)
    # b_ref:  [1, 50]   f32
    # o_ref:  [TB, 50]  f32
    x = x_ref[...].astype(wt_ref.dtype)

    # MXU matmul with f32 accumulation, bias + ReLU on the VPU.
    z = jnp.dot(x, wt_ref[...], preferred_element_type=jnp.float32) + b_ref[...]
    z = jnp.maximum(z, 0.0)

    # Numerically stable softmax along the feature axis (PyTorch dim=1).
    m = jnp.max(z, axis=-1, keepdims=True)
    e = jnp.exp(z - m)
    s = jnp.sum(e, axis=-1, keepdims=True)
    # Exact reciprocal on the EUP slot (approx=True buys nothing in an HBM-bound kernel).
    o_ref[...] = (e * pl.reciprocal(s, approx=False)).astype(o_ref.dtype)


def prepare_params(weight, bias, matmul_dtype=jnp.bfloat16):
    """One-time (offline) parameter prep.

    weight: [50, 100] f32 (PyTorch nn.Linear layout), bias: [50] f32.
    Returns wt [100, 50] bf16 and bias [1, 50] f32.
    """
    wt = weight.T.astype(matmul_dtype)                      # [100, 50]
    b = bias.astype(jnp.float32).reshape(1, OUT_FEATURES)   # [1, 50]
    return wt, b


def simplenet_forward(x, wt, b, tb_max=TB_MAX):
    """x: [B, 100] f32. Returns [B, 50] f32 softmax probabilities."""
    B = x.shape[0]
    # Batch tile: multiple of 8 (sublane), capped at tb_max, and clamped so the grid keeps
    # >= 2 steps when B is large (megacore sharding + DMA/compute overlap).
    TB = min(tb_max, max(8, _round_up(pl.cdiv(B, 2), 8)))
    grid = (pl.cdiv(B, TB),)   # ragged final block is clipped by Pallas (masked stores)

    bytes_accessed = (
        B * IN_FEATURES * 4                      # x read (f32)
        + IN_FEATURES * OUT_FEATURES * 2         # weight read (bf16, counted once)
        + OUT_FEATURES * 4                       # bias read
        + B * OUT_FEATURES * 4                   # output write (f32)
    )

    out = pl.pallas_call(
        simplenet_kernel,
        out_shape=jax.ShapeDtypeStruct((B, OUT_FEATURES), jnp.float32),
        grid=grid,
        in_specs=[
            pl.BlockSpec((TB, IN_FEATURES), lambda i: (i, 0)),
            pl.BlockSpec((IN_FEATURES, OUT_FEATURES), lambda i: (0, 0)),
            pl.BlockSpec((1, OUT_FEATURES), lambda i: (0, 0)),
        ],
        out_specs=pl.BlockSpec((TB, OUT_FEATURES), lambda i: (i, 0)),
        compiler_params=pltpu.CompilerParams(
            dimension_semantics=("parallel",),   # megacore sharding of the batch axis
        ),
        cost_estimate=pl.CostEstimate(
            flops=2 * B * IN_FEATURES * OUT_FEATURES,
            transcendentals=B * OUT_FEATURES,
            bytes_accessed=int(bytes_accessed),
        ),
    )(x, wt, b)

    return out


def reference_forward(x, weight, bias, matmul_dtype=jnp.bfloat16):
    """Pure-JAX reference matching the kernel's bf16-input / f32-accumulate matmul."""
    xr = x.astype(matmul_dtype).astype(jnp.float32)
    wr = weight.astype(matmul_dtype).astype(jnp.float32)
    y = xr @ wr.T + bias
    y = jnp.maximum(y, 0.0)
    return jax.nn.softmax(y, axis=1)


if __name__ == "__main__":
    key = jax.random.PRNGKey(0)
    k_x, k_w, k_b = jax.random.split(key, 3)

    B = 8
    # Deterministic parameter init (shapes per nn.Linear(100, 50)).
    bound = 1.0 / (IN_FEATURES ** 0.5)
    weight = jax.random.uniform(k_w, (OUT_FEATURES, IN_FEATURES),
                                minval=-bound, maxval=bound, dtype=jnp.float32)
    bias = jax.random.uniform(k_b, (OUT_FEATURES,),
                              minval=-bound, maxval=bound, dtype=jnp.float32)
    x = jax.random.normal(k_x, (B, IN_FEATURES), dtype=jnp.float32)

    # One-time parameter prep (transpose + bf16 cast), outside the hot path.
    wt, b = prepare_params(weight, bias)

    out = simplenet_forward(x, wt, b)
    out = jax.block_until_ready(out)

    ref = reference_forward(x, weight, bias)
    assert out.shape == (B, OUT_FEATURES)
    assert jnp.allclose(out, ref, atol=1e-4, rtol=1e-4), "mismatch vs reference"
    assert jnp.allclose(jnp.sum(out, axis=1), 1.0, atol=1e-5), "softmax rows must sum to 1"
    assert bool(jnp.all(jnp.isfinite(out))), "non-finite values in output"

    print("KERNEL_OK")
</pallas_src>

<mosaic_0001>
module attributes {stable_mosaic.version = 11 : i64} {
  func.func @simplenet_kernel(%arg0: i32, %arg1: memref<8x100xf32, #tpu.memory_space<vmem>>, %arg2: memref<100x50xbf16, #tpu.memory_space<vmem>>, %arg3: memref<1x50xf32, #tpu.memory_space<vmem>>, %arg4: memref<8x50xf32, #tpu.memory_space<vmem>>) attributes {dimension_semantics = [#tpu.dimension_semantics<parallel>], iteration_bounds = array<i64: 1>, scalar_prefetch = 0 : i64, scratch_operands = 0 : i64, tpu.core_type = #tpu.core_type<tc>, window_params = [{transform_indices = @transform_0, window_bounds = array<i64: 8, 100>}, {pipeline_mode = #tpu.pipeline_mode<synchronous>, transform_indices = @transform_1, window_bounds = array<i64: 100, 50>}, {pipeline_mode = #tpu.pipeline_mode<synchronous>, transform_indices = @transform_2, window_bounds = array<i64: 1, 50>}, {transform_indices = @transform_3, window_bounds = array<i64: 8, 50>}]} {
    %c0 = arith.constant 0 : index
    %c0_0 = arith.constant 0 : index
    %0 = vector.load %arg1[%c0, %c0_0] : memref<8x100xf32, #tpu.memory_space<vmem>>, vector<8x100xf32>
    %1 = arith.truncf %0 : vector<8x100xf32> to vector<8x100xbf16>
    %c0_1 = arith.constant 0 : index
    %c0_2 = arith.constant 0 : index
    %2 = vector.load %arg2[%c0_1, %c0_2] : memref<100x50xbf16, #tpu.memory_space<vmem>>, vector<100x50xbf16>
    %cst = arith.constant dense<0.000000e+00> : vector<8x50xf32>
    %3 = tpu.matmul %1, %2, %cst {dimension_numbers = #tpu.dot_dimension_numbers<[1], [0], [0], [1], [0, 0, 1, 1], [], []>} : vector<8x100xbf16>, vector<100x50xbf16>, vector<8x50xf32> -> vector<8x50xf32>
    %c0_3 = arith.constant 0 : index
    %c0_4 = arith.constant 0 : index
    %4 = vector.load %arg3[%c0_3, %c0_4] : memref<1x50xf32, #tpu.memory_space<vmem>>, vector<1x50xf32>
    %5 = vector.broadcast %4 : vector<1x50xf32> to vector<8x50xf32>
    %6 = arith.addf %3, %5 : vector<8x50xf32>
    %cst_5 = arith.constant 0.000000e+00 : f32
    %7 = vector.broadcast %cst_5 : f32 to vector<8x50xf32>
    %8 = arith.maximumf %6, %7 : vector<8x50xf32>
    %cst_6 = arith.constant dense<0xFF800000> : vector<8xf32>
    %9 = vector.multi_reduction <maximumf>, %8, %cst_6 [1] : vector<8x50xf32> to vector<8xf32>
    %10 = vector.shape_cast %9 : vector<8xf32> to vector<8x1xf32>
    %11 = vector.broadcast %10 : vector<8x1xf32> to vector<8x50xf32>
    %12 = arith.subf %8, %11 : vector<8x50xf32>
    %13 = math.exp %12 : vector<8x50xf32>
    %cst_7 = arith.constant dense<0.000000e+00> : vector<8xf32>
    %14 = vector.multi_reduction <add>, %13, %cst_7 [1] : vector<8x50xf32> to vector<8xf32>
    %15 = vector.shape_cast %14 : vector<8xf32> to vector<8x1xf32>
    %16 = tpu.reciprocal %15 : vector<8x1xf32> -> vector<8x1xf32>
    %17 = vector.broadcast %16 : vector<8x1xf32> to vector<8x50xf32>
    %18 = arith.mulf %13, %17 : vector<8x50xf32>
    %c0_8 = arith.constant 0 : index
    %c0_9 = arith.constant 0 : index
    %19 = vector.load %arg4[%c0_8, %c0_9] : memref<8x50xf32, #tpu.memory_space<vmem>>, vector<8x50xf32>
    tpu.vector_store %arg4[%c0_8, %c0_9], %18 {strides = array<i32>} : memref<8x50xf32, #tpu.memory_space<vmem>>, vector<8x50xf32>,
    return
  }
  func.func @transform_0(%arg0: i32) -> (i32, i32) {
    %c0_i32 = arith.constant 0 : i32
    %c0_i32_0 = arith.constant 0 : i32
    return %arg0, %c0_i32 : i32, i32
  }
  func.func @transform_1(%arg0: i32) -> (i32, i32) {
    %c0_i32 = arith.constant 0 : i32
    %c0_i32_0 = arith.constant 0 : i32
    %c0_i32_1 = arith.constant 0 : i32
    return %c0_i32, %c0_i32_0 : i32, i32
  }
  func.func @transform_2(%arg0: i32) -> (i32, i32) {
    %c0_i32 = arith.constant 0 : i32
    %c0_i32_0 = arith.constant 0 : i32
    %c0_i32_1 = arith.constant 0 : i32
    return %c0_i32, %c0_i32_0 : i32, i32
  }
  func.func @transform_3(%arg0: i32) -> (i32, i32) {
    %c0_i32 = arith.constant 0 : i32
    %c0_i32_0 = arith.constant 0 : i32
    return %arg0, %c0_i32 : i32, i32
  }
}

</mosaic_0001>

<bundles_post_ra>
// kernel: tpu_custom_call.1
= control target key start
LH: loop header
LB: loop body
LE: loop exit
PB: predicated region body
PF: predicated region fallthrough
CT: control target
= control target key end

     0   :  { %vm78_vm0 = vcmask 1041408   ;;  %s255_s0 = inlined_call_operand.vmem [shape: f32[8,100], index: 0, kind: input, shape index: {}]   ;;  %s256_s1 = inlined_call_operand.vmem [shape: bf16[100,50], index: 1, kind: input, shape index: {}]   ;;  %s257_s2 = inlined_call_operand.vmem [shape: f32[1,50], index: 2, kind: input, shape index: {}]   ;;  %s258_s3 = inlined_call_operand.hbm [shape: f32[8,50], index: 3, kind: output, shape index: {}]  }
   0x1   :  { %v30_v0 = vld [vmem:[%s256_s1 + $0x30] sm:$0x3] }
   0x2   :  { %v60_v1 = vunpack.c.l.b16 %v30_v0 }
   0x4   :  { %v67_v2 = vpack.c.b16 %v60_v1, %v60_v1 }
   0x5   :  { %8 = vsyncpa [#allocation3], 0  ;;  %v168_v4 = vld [vmem:[%s256_s1 + $0x28] sm:$0xff]  ;;  %v167_v5 = vld [vmem:[%s256_s1 + $0x20] sm:$0xff]  ;;  %vm74_vm1 = vcmask 818176   ;;  %vm96_vm2 = vcmask 408576  }
   0x6   :  { %v80_v3 = vsel %vm78_vm0, %v67_v2, 0  ;;  %v166_v6 = vld [vmem:[%s256_s1 + $0x18] sm:$0xff]  ;;  %v165_v7 = vld [vmem:[%s256_s1 + $0x10] sm:$0xff]  ;;  %v164_v8 = vld [vmem:[%s256_s1 + $0x8] sm:$0xff]  ;;  %s129_s4 = sshll.u32 %s258_s3, 4  ;;  %s130_s4 = int_to_ptr.hbm [resolvable:$true] %s129_s4 }
   0x7   :  { %83 = vmatpush.bf16.msra.mxu0 %v80_v3  ;;  %v163_v9 = vld [vmem:[%s256_s1] sm:$0xff] }
   0x8   :  { %v16_v10 = vld [vmem:[%s255_s0] sm:$0xff]  ;;  %s201_s0 = smov [#allocation2]  }
   0x9   :  { %v17_v11 = vpack.c.bf16 %v16_v10, %v16_v10  ;;  %v170_v12 = vld [vmem:[%s257_s2] ss:$0 sm:$0xff]  ;;  %s127_s1 = sshll.u32 %s201_s0, 4  ;;  %s128_s1 = int_to_ptr.vmem [resolvable:$true] %s127_s1 }
   0xb   :  { %84 = vmatpush.bf16.msra.mxu0 %v168_v4 }
   0xf   :  { %85 = vmatpush.bf16.msra.mxu0 %v167_v5 }
  0x13   :  { %86 = vmatpush.bf16.msra.mxu0 %v166_v6 }
  0x17   :  { %87 = vmatpush.bf16.msra.mxu0 %v165_v7 }
  0x1b   :  { %88 = vmatpush.bf16.msra.mxu0 %v164_v8 }
  0x1f   :  { %89 = vmatpush.bf16.msra.mxu0 %v163_v9 }
  0x22   :  { %162 = vmatmul.msk.bf16.vlgmr.msra.gmra.mxu0 %vm74_vm1, %v17_v11 }
  0x9f   :  { %v91_v13 = vpop.f32.mrf.mxu0 }
  0xa0   :  { %v92_v14 = vadd.f32 %v170_v12, %v91_v13 }
  0xa2   :  { %v95_v15 = vmax.f32 %v92_v14, 0.0 }
  0xa4   :  { %v97_v16 = vsel %vm96_vm2, %v95_v15, -inf }
  0xa5   :  { %98 = vmax.xlane.f32.xlu0 %v97_v16 }
  0xa7   :  { %v93_v17 = vpop.f32.mrf.mxu0 }
 0x118   :  { %v99_v18 = vpop.xlane.xlu0 %98 }
 0x119   :  { %v100_v19 = vsub.f32 %v95_v15, %v99_v18 }
 0x11b   :  { %v101_v20 = vmul.f32 1.442695, %v100_v19 }
 0x11d   :  { %171 = vpow2.f32 %v101_v20 }
 0x123   :  { %v172_v21 = vpop.eup %171 }
 0x124   :  { %v103_v22 = vsel %vm96_vm2, %v172_v21, 0.0 }
 0x125   :  { %104 = vadd.xlane.f32.xlu0 %v103_v22 }
 0x198   :  { %v105_v23 = vpop.xlane.xlu0 %104 }
 0x199   :  { %173 = vrcp.f32 %v105_v23  ;;  %v117_v27 = vand.u32 2147483648, %v105_v23  ;;  %v115_v29 = vand.u32 2147483647, %v105_v23  ;;  %vm111_vm4 = vweird.f32 %v105_v23 }
 0x19b   :  { %v118_v31 = vor.u32 1.1754944e-38, %v117_v27  ;;  %vm116_vm6 = vcmp.eq.f32.partialorder %v115_v29, 8.507059e+37 }
 0x19f   :  { %v174_v24 = vpop.eup %173 }
 0x1a0   :  { %v107_v25 = vmul.f32 %v174_v24, %v105_v23  ;;  %vm112_vm3 = vweird.f32 %v174_v24 }
 0x1a1   :  { %vm113_vm5 = vmor %vm111_vm4, %vm112_vm3 }
 0x1a2   :  { %v108_v26 = vsub.f32 1.0, %v107_v25 }
 0x1a4   :  { %v109_v28 = vmul.f32 %v174_v24, %v108_v26 }
 0x1a6   :  { %v110_v30 = vadd.f32 %v174_v24, %v109_v28 }
 0x1a8   :  { %v114_v32 = vsel %vm113_vm5, %v174_v24, %v110_v30 }
 0x1a9   :  { %v119_v33 = vsel %vm116_vm6, %v118_v31, %v114_v32 }
 0x1aa   :  { %v120_v34 = vmul.f32 %v172_v21, %v119_v33 }
 0x1ac   :  { %121 = vst.msk [vmem:[#allocation2] sm:$0xff] %vm96_vm2, %v120_v34 }
 0x1ad   :  { %132 = dma.vmem_to_hbm [thread:$0]  %s128_s1, 128, %s130_s4, [#allocation3]  }
 0x1ae   :  { %199 = dma.done.wait [#allocation3], 128  }
 0x1af   :  { %200 = vsyncadd [#allocation3], 4294967168 }
 0x1b0   :  { %137 = vsyncpa [#allocation3], 1 }

</bundles_post_ra>
